<compile_context>
chip_gen: v6e
topology: v6e:2x2x1
jax: 0.10.0
libtpu: 0.0.40
codegen_flags: <defaults>
</compile_context>

<pallas_src>
import functools

import numpy as np
import jax
import jax.numpy as jnp
from jax.experimental import pallas as pl
from jax.experimental.pallas import tpu as pltpu


FIR_SIZE = 4
# 2D FIR = outer(f, f) / sum  ==  outer(f/8, f/8)  -> separable 1-D factor:
_FIR_1D = (np.array([1.0, 3.0, 3.0, 1.0]) / 8.0).astype(np.float64)

_VMEM_LIMIT_BYTES = 40 * 1024 * 1024   # > default scoped limit on v5e/v6e, < v7x physical
_KRON_MAX_BYTES = 4 << 20              # use the single-matmul Kronecker path below this
_KRON_X_BLOCK_BUDGET = 4 << 20
_SEP_X_BLOCK_BUDGET = 2 << 20


# ------------------------- host-side operator construction -------------------------
@functools.lru_cache(maxsize=None)
def _upfirdn1d_matrix(n_in, up, down, pad0, pad1):
    """Dense (n_out, n_in) matrix M so that y = M @ x reproduces 1-D upfirdn
    (zero-insert upsample by `up`, pad (pad0, pad1), true convolution with the
    [1,3,3,1]/8 kernel, downsample by `down`)."""
    kernel1d = _FIR_1D
    K = len(kernel1d)
    n_out = (n_in * up + pad0 + pad1 - K) // down + 1
    assert n_out > 0, "invalid upfirdn geometry"
    M = np.zeros((n_out, n_in), dtype=np.float64)
    for i in range(n_out):
        for k in range(K):
            m = i * down + k - pad0          # index into the zero-inserted signal
            if m < 0 or m % up != 0:
                continue
            j = m // up
            if 0 <= j < n_in:
                M[i, j] += kernel1d[K - 1 - k]   # flipped kernel (convolution)
    return M


@functools.lru_cache(maxsize=None)
def _operators(H, W, up, down, pad):
    px0, px1, py0, py1 = pad
    Mh = _upfirdn1d_matrix(H, up, down, py0, py1)     # (out_h, H)
    Mw = _upfirdn1d_matrix(W, up, down, px0, px1)     # (out_w, W)
    M2T = np.kron(Mh, Mw).T                           # (H*W, out_h*out_w)
    return Mh, Mw, M2T


# ----------------------------------- kernels ---------------------------------------
def _kron_kernel(m2t_ref, x_ref, o_ref):
    # m2t_ref: (H*W, out_h*out_w)   x_ref: (TB, H*W)   o_ref: (TB, out_h*out_w)
    # One tall, lane-dense matmul; batch packed into the MXU M dimension.
    o_ref[...] = jnp.dot(
        x_ref[...], m2t_ref[...], preferred_element_type=jnp.float32
    ).astype(o_ref.dtype)


def _separable_kernel(mh_ref, mwt_ref, x_ref, o_ref):
    # mh_ref: (out_h, H)   mwt_ref: (W, out_w)   x_ref: (TB, H, W)   o_ref: (TB, out_h, out_w)
    tb, h, w = x_ref.shape
    out_h = mh_ref.shape[0]
    out_w = mwt_ref.shape[1]
    # W-side as one tall matmul over the whole batch tile.
    x2 = x_ref[...].reshape(tb * h, w)
    t = jnp.dot(x2, mwt_ref[...], preferred_element_type=jnp.float32)   # (tb*h, out_w)
    t3 = t.reshape(tb, h, out_w).astype(mh_ref.dtype)
    # H-side as a batched matmul over the tile (flash-attention-style batched dot).
    mh_b = jnp.broadcast_to(mh_ref[...], (tb, out_h, h))
    o = jnp.einsum('boh,bhw->bow', mh_b, t3, preferred_element_type=jnp.float32)
    o_ref[...] = o.astype(o_ref.dtype)


# ----------------------------------- wrapper ----------------------------------------
def upfirdn2d_pallas(x_nchw, up, down, pad, *, force_path=None):
    """upfirdn2d with the separable [1,3,3,1]x[1,3,3,1]/64 FIR.  pad = (px0, px1, py0, py1)."""
    N, C, H, W = x_nchw.shape
    Mh_np, Mw_np, M2T_np = _operators(H, W, up, down, tuple(int(p) for p in pad))
    out_h, out_w = Mh_np.shape[0], Mw_np.shape[0]
    B = N * C

    act_dtype = x_nchw.dtype
    w_dtype = jnp.bfloat16 if act_dtype == jnp.bfloat16 else jnp.float32
    w_itemsize = jnp.dtype(w_dtype).itemsize
    itemsize = jnp.dtype(act_dtype).itemsize

    use_kron = (M2T_np.size * w_itemsize) <= _KRON_MAX_BYTES
    if force_path == "kron":
        use_kron = True
    elif force_path == "separable":
        use_kron = False

    cparams = pltpu.CompilerParams(
        dimension_semantics=("parallel",),
        vmem_limit_bytes=_VMEM_LIMIT_BYTES,
    )

    if use_kron:
        HW, OHW = H * W, out_h * out_w
        # Batch tile: multiple of 8 (sublane rule for the (TB, HW) block), sized so the
        # double-buffered x/out blocks stay well inside VMEM.
        per_img = (HW + OHW) * itemsize
        tb = int(_KRON_X_BLOCK_BUDGET // max(per_img, 1))
        tb = max(8, min(512, (tb // 8) * 8))
        tb = min(tb, ((B + 7) // 8) * 8)
        b_pad = ((B + tb - 1) // tb) * tb
        if b_pad // tb == 1 and B > 8:
            # keep >= 2 grid steps so both v7x TensorCores get work
            tb = max(8, ((b_pad // 2) // 8) * 8)
            b_pad = ((B + tb - 1) // tb) * tb

        x2 = x_nchw.reshape(B, HW)
        if b_pad != B:
            x2 = jnp.pad(x2, ((0, b_pad - B), (0, 0)))
        m2t = jnp.asarray(M2T_np, dtype=w_dtype)

        out = pl.pallas_call(
            _kron_kernel,
            out_shape=jax.ShapeDtypeStruct((b_pad, OHW), act_dtype),
            grid_spec=pltpu.PrefetchScalarGridSpec(
                num_scalar_prefetch=0,
                grid=(b_pad // tb,),
                in_specs=[
                    pl.BlockSpec((HW, OHW), lambda i: (0, 0)),   # kron operator (replicated)
                    pl.BlockSpec((tb, HW), lambda i: (i, 0)),    # TB flattened images
                ],
                out_specs=pl.BlockSpec((tb, OHW), lambda i: (i, 0)),
            ),
            compiler_params=cparams,
        )(m2t, x2)
        return out[:B].reshape(N, C, out_h, out_w)

    # ---- separable path (larger images) ----
    # TODO(synk): exploit the banded structure of Mh/Mw (tile out_h/out_w with an input
    # halo) for very large resolutions; the dense formulation's per-image working set can
    # exceed v7x VMEM around 1024x1024.
    per_img = (H * W + H * out_w + out_h * out_w + out_h * H) * 4
    tb = int(_SEP_X_BLOCK_BUDGET // max(per_img, 1))
    tb = max(1, min(256, tb))
    if B >= 2:
        tb = min(tb, max(1, B // 2))   # keep >= 2 grid steps when possible
    b_pad = ((B + tb - 1) // tb) * tb

    x3 = x_nchw.reshape(B, H, W)
    if b_pad != B:
        x3 = jnp.pad(x3, ((0, b_pad - B), (0, 0), (0, 0)))
    mh = jnp.asarray(Mh_np, dtype=w_dtype)
    mwt = jnp.asarray(Mw_np.T, dtype=w_dtype)

    out = pl.pallas_call(
        _separable_kernel,
        out_shape=jax.ShapeDtypeStruct((b_pad, out_h, out_w), act_dtype),
        grid_spec=pltpu.PrefetchScalarGridSpec(
            num_scalar_prefetch=0,
            grid=(b_pad // tb,),
            in_specs=[
                pl.BlockSpec((out_h, H), lambda i: (0, 0)),       # M_h   (replicated)
                pl.BlockSpec((W, out_w), lambda i: (0, 0)),       # M_w^T (replicated)
                pl.BlockSpec((tb, H, W), lambda i: (i, 0, 0)),    # TB images per step
            ],
            out_specs=pl.BlockSpec((tb, out_h, out_w), lambda i: (i, 0, 0)),
        ),
        compiler_params=cparams,
    )(mh, mwt, x3)
    return out[:B].reshape(N, C, out_h, out_w)


class UpFIRDown:
    """JAX/Pallas port of the PyTorch UpFIRDown module (forward semantics only)."""

    def __init__(self, *, up: int = 1, down: int = 1, conv_kernel_size=None):
        self.FIR_size = FIR_SIZE
        self.up = up
        self.down = down
        self.conv_kernel_size = conv_kernel_size

    def __call__(self, x, *, force_path=None):
        if self.conv_kernel_size is None:
            up = self.up
            down = self.down
            cks = 1
        else:
            up = 1
            down = 1
            cks = self.conv_kernel_size
        if self.up != 1:
            p = self.FIR_size - self.up - (cks - 1)
            pad = ((p + 1) // 2 + self.up - 1, p // 2 + (2 - up),
                   (p + 1) // 2 + self.up - 1, p // 2 + (2 - up))
            return upfirdn2d_pallas(x, up, down, pad, force_path=force_path)
        elif self.down != 1:
            p = self.FIR_size - self.down + (cks - 1)
            pad = ((p + 1) // 2 + self.up - 1, p // 2,
                   (p + 1) // 2 + self.up - 1, p // 2)
            return upfirdn2d_pallas(x, up, down, pad, force_path=force_path)
        else:
            assert False  # matches original module (no identity / conv-only path)


# ---------- pure-numpy reference (mirrors rosinality upfirdn2d_native) ----------
def _upfirdn2d_ref(x, kernel2d, up, down, pad):
    px0, px1, py0, py1 = pad
    N, C, H, W = x.shape
    kh, kw = kernel2d.shape
    xu = np.zeros((N, C, H * up, W * up), dtype=np.float64)
    xu[:, :, ::up, ::up] = x
    xp = np.pad(xu, ((0, 0), (0, 0),
                     (max(py0, 0), max(py1, 0)),
                     (max(px0, 0), max(px1, 0))))
    xp = xp[:, :, max(-py0, 0): xp.shape[2] - max(-py1, 0),
            max(-px0, 0): xp.shape[3] - max(-px1, 0)]
    w = kernel2d[::-1, ::-1]
    Hp, Wp = xp.shape[2], xp.shape[3]
    out_h = (Hp - kh) // down + 1
    out_w = (Wp - kw) // down + 1
    out = np.zeros((N, C, out_h, out_w), dtype=np.float64)
    for i in range(out_h):
        for j in range(out_w):
            patch = xp[:, :, i * down:i * down + kh, j * down:j * down + kw]
            out[:, :, i, j] = np.sum(patch * w, axis=(2, 3))
    return out


if __name__ == "__main__":
    key = jax.random.PRNGKey(0)
    x = jax.random.normal(key, (2, 4, 16, 16), dtype=jnp.float32)
    x_np = np.asarray(x, dtype=np.float64)

    f = np.array([1.0, 3.0, 3.0, 1.0])
    fir2d = np.outer(f, f) / np.outer(f, f).sum()

    down_mod = UpFIRDown(down=2)
    up_mod = UpFIRDown(up=2)

    # Case 1 ref: anti-aliased downsample by 2 -> upfirdn2d(up=1, down=2, pad=(1,1,1,1))
    ref_down = _upfirdn2d_ref(x_np, fir2d, up=1, down=2, pad=(1, 1, 1, 1))
    # Case 2 ref: zero-insert upsample by 2 + FIR -> upfirdn2d(up=2, down=1, pad=(2,1,2,1))
    ref_up = _upfirdn2d_ref(x_np, fir2d, up=2, down=1, pad=(2, 1, 2, 1))

    # Exercise both kernel paths (kron single-matmul and batched separable).
    for path in ("kron", "separable"):
        y_down = jax.block_until_ready(down_mod(x, force_path=path))
        assert y_down.shape == (2, 4, 8, 8), (path, y_down.shape)
        np.testing.assert_allclose(np.asarray(y_down), ref_down, rtol=1e-5, atol=1e-5)

        y_up = jax.block_until_ready(up_mod(x, force_path=path))
        assert y_up.shape == (2, 4, 32, 32), (path, y_up.shape)
        np.testing.assert_allclose(np.asarray(y_up), ref_up, rtol=1e-5, atol=1e-5)

    # Default auto path selection.
    y_auto = jax.block_until_ready(down_mod(x))
    np.testing.assert_allclose(np.asarray(y_auto), ref_down, rtol=1e-5, atol=1e-5)

    print("KERNEL_OK")
</pallas_src>

<mosaic_0001>
module attributes {stable_mosaic.version = 11 : i64} {
  func.func @_kron_kernel(%arg0: i32, %arg1: memref<256x64xf32, #tpu.memory_space<vmem>>, %arg2: memref<8x256xf32, #tpu.memory_space<vmem>>, %arg3: memref<8x64xf32, #tpu.memory_space<vmem>>) attributes {dimension_semantics = [#tpu.dimension_semantics<parallel>], iteration_bounds = array<i64: 1>, scalar_prefetch = 0 : i64, scratch_operands = 0 : i64, tpu.core_type = #tpu.core_type<tc>, window_params = [{pipeline_mode = #tpu.pipeline_mode<synchronous>, transform_indices = @transform_0, window_bounds = array<i64: 256, 64>}, {transform_indices = @transform_1, window_bounds = array<i64: 8, 256>}, {transform_indices = @transform_2, window_bounds = array<i64: 8, 64>}]} {
    %c0 = arith.constant 0 : index
    %c0_0 = arith.constant 0 : index
    %0 = vector.load %arg2[%c0, %c0_0] : memref<8x256xf32, #tpu.memory_space<vmem>>, vector<8x256xf32>
    %c0_1 = arith.constant 0 : index
    %c0_2 = arith.constant 0 : index
    %1 = vector.load %arg1[%c0_1, %c0_2] : memref<256x64xf32, #tpu.memory_space<vmem>>, vector<256x64xf32>
    %cst = arith.constant dense<0.000000e+00> : vector<8x64xf32>
    %2 = tpu.matmul %0, %1, %cst {dimension_numbers = #tpu.dot_dimension_numbers<[1], [0], [0], [1], [0, 0, 1, 1], [], []>} : vector<8x256xf32>, vector<256x64xf32>, vector<8x64xf32> -> vector<8x64xf32>
    %c0_3 = arith.constant 0 : index
    %c0_4 = arith.constant 0 : index
    %3 = vector.load %arg3[%c0_3, %c0_4] : memref<8x64xf32, #tpu.memory_space<vmem>>, vector<8x64xf32>
    tpu.vector_store %arg3[%c0_3, %c0_4], %2 {strides = array<i32>} : memref<8x64xf32, #tpu.memory_space<vmem>>, vector<8x64xf32>,
    return
  }
  func.func @transform_0(%arg0: i32) -> (i32, i32) {
    %c0_i32 = arith.constant 0 : i32
    %c0_i32_0 = arith.constant 0 : i32
    %c0_i32_1 = arith.constant 0 : i32
    return %c0_i32, %c0_i32_0 : i32, i32
  }
  func.func @transform_1(%arg0: i32) -> (i32, i32) {
    %c0_i32 = arith.constant 0 : i32
    %c0_i32_0 = arith.constant 0 : i32
    return %arg0, %c0_i32 : i32, i32
  }
  func.func @transform_2(%arg0: i32) -> (i32, i32) {
    %c0_i32 = arith.constant 0 : i32
    %c0_i32_0 = arith.constant 0 : i32
    return %arg0, %c0_i32 : i32, i32
  }
}

</mosaic_0001>

<bundles_post_ra>
// kernel: tpu_custom_call.1
= control target key start
LH: loop header
LB: loop body
LE: loop exit
PB: predicated region body
PF: predicated region fallthrough
CT: control target
= control target key end

     0   :  { %s311_s0 = inlined_call_operand.vmem [shape: f32[256,64], index: 0, kind: input, shape index: {}]   ;;  %s312_s1 = inlined_call_operand.vmem [shape: f32[8,256], index: 1, kind: input, shape index: {}]   ;;  %s313_s2 = inlined_call_operand.hbm [shape: f32[8,64], index: 2, kind: output, shape index: {}]  }
   0x1   :  { %v45_v0 = vld [vmem:[%s311_s0 + $0xf8] sm:$0xff]  ;;  %v44_v2 = vld [vmem:[%s311_s0 + $0xf0] sm:$0xff]  ;;  %v43_v4 = vld [vmem:[%s311_s0 + $0xe8] sm:$0xff] }
   0x2   :  { %v29_v1 = vld [vmem:[%s311_s0 + $0x78] sm:$0xff]  ;;  %132 = vmatprep.subr.mxu0 %v45_v0  ;;  %v28_v3 = vld [vmem:[%s311_s0 + $0x70] sm:$0xff]  ;;  %v27_v5 = vld [vmem:[%s311_s0 + $0x68] sm:$0xff] }
   0x3   :  { %133 = vmatpush3.msra.mxu0 %v29_v1  ;;  %v42_v6 = vld [vmem:[%s311_s0 + $0xe0] sm:$0xff]  ;;  %v41_v8 = vld [vmem:[%s311_s0 + $0xd8] sm:$0xff]  ;;  %v40_v10 = vld [vmem:[%s311_s0 + $0xd0] sm:$0xff] }
   0x4   :  { %134 = vmatprep.subr.mxu0 %v44_v2  ;;  %v26_v7 = vld [vmem:[%s311_s0 + $0x60] sm:$0xff]  ;;  %v25_v9 = vld [vmem:[%s311_s0 + $0x58] sm:$0xff]  ;;  %v24_v11 = vld [vmem:[%s311_s0 + $0x50] sm:$0xff] }
   0x5   :  { %135 = vmatpush3.msra.mxu0 %v28_v3  ;;  %v39_v12 = vld [vmem:[%s311_s0 + $0xc8] sm:$0xff] }
   0x6   :  { %136 = vmatprep.subr.mxu0 %v43_v4  ;;  %v13_v13 = vld [vmem:[%s312_s1 + $0x8] sm:$0xff] }
   0x7   :  { %137 = vmatpush3.msra.mxu0 %v27_v5  ;;  %v23_v14 = vld [vmem:[%s311_s0 + $0x48] sm:$0xff]  ;;  %110 = vmatprep.mubr.f32.mxu0 %v13_v13 }
   0x8   :  { %138 = vmatprep.subr.mxu0 %v42_v6 }
   0x9   :  { %139 = vmatpush3.msra.mxu0 %v26_v7 }
   0xa   :  { %140 = vmatprep.subr.mxu0 %v41_v8 }
   0xb   :  { %141 = vmatpush3.msra.mxu0 %v25_v9 }
   0xc   :  { %142 = vmatprep.subr.mxu0 %v40_v10 }
   0xd   :  { %7 = vsyncpa [#allocation3], 0  ;;  %143 = vmatpush3.msra.mxu0 %v24_v11  ;;  %v38_v15 = vld [vmem:[%s311_s0 + $0xc0] sm:$0xff]  ;;  %v37_v17 = vld [vmem:[%s311_s0 + $0xb8] sm:$0xff]  ;;  %s190_s21 = smov [#allocation2]   ;;  %vm116_vm0 = vcmask 523264  }
   0xe   :  { %144 = vmatprep.subr.mxu0 %v39_v12  ;;  %v22_v16 = vld [vmem:[%s311_s0 + $0x40] sm:$0xff]  ;;  %v21_v18 = vld [vmem:[%s311_s0 + $0x38] sm:$0xff]  ;;  %v36_v19 = vld [vmem:[%s311_s0 + $0xb0] sm:$0xff]  ;;  %s124_s22 = sshll.u32 %s190_s21, 4  ;;  %s125_s22 = int_to_ptr.vmem [resolvable:$true] %s124_s22 }
   0xf   :  { %145 = vmatpush3.msra.mxu0 %v23_v14  ;;  %v20_v20 = vld [vmem:[%s311_s0 + $0x30] sm:$0xff]  ;;  %v35_v21 = vld [vmem:[%s311_s0 + $0xa8] sm:$0xff]  ;;  %v34_v23 = vld [vmem:[%s311_s0 + $0xa0] sm:$0xff]  ;;  %s168_s23 = scalar_lea.vmem %s125_s22, 128  ;;  %p173_p1 = scmp.lt.s32.totalorder %s125_s22, %s125_s22 }
  0x10   :  { %146 = vmatprep.subr.mxu0 %v38_v15  ;;  %v19_v22 = vld [vmem:[%s311_s0 + $0x28] sm:$0xff]  ;;  %v18_v24 = vld [vmem:[%s311_s0 + $0x20] sm:$0xff]  ;;  %v33_v25 = vld [vmem:[%s311_s0 + $0x98] sm:$0xff]  ;;  %p169_p0 = scmp.ne.s32.totalorder %s125_s22, %s168_s23  ;;  %p174_p2 = scmp.lt.s32.totalorder %s168_s23, %s168_s23 }
  0x11   :  { %147 = vmatpush3.msra.mxu0 %v22_v16  ;;  %v17_v26 = vld [vmem:[%s311_s0 + $0x18] sm:$0xff]  ;;  %v32_v27 = vld [vmem:[%s311_s0 + $0x90] sm:$0xff]  ;;  %v31_v29 = vld [vmem:[%s311_s0 + $0x88] sm:$0xff] }
  0x12   :  { %148 = vmatprep.subr.mxu0 %v37_v17  ;;  %v16_v28 = vld [vmem:[%s311_s0 + $0x10] sm:$0xff]  ;;  %v15_v30 = vld [vmem:[%s311_s0 + $0x8] sm:$0xff]  ;;  %v30_v31 = vld [vmem:[%s311_s0 + $0x80] sm:$0xff]  ;;  %p175_p3 = por %p174_p2, %p173_p1 }
  0x13   :  { %149 = vmatpush3.msra.mxu0 %v21_v18  ;;  %v14_v32 = vld [vmem:[%s311_s0] sm:$0xff] }
  0x14   :  { %150 = vmatprep.subr.mxu0 %v36_v19  ;;  %v12_v33 = vld [vmem:[%s312_s1] sm:$0xff]  ;;  %p176_p4 = pnand %p175_p3, %p169_p0 }
  0x15   :  { %151 = vmatpush3.msra.mxu0 %v20_v20 }
  0x16   :  { %152 = vmatprep.subr.mxu0 %v35_v21 }
  0x17   :  { %153 = vmatpush3.msra.mxu0 %v19_v22 }
  0x18   :  { %154 = vmatprep.subr.mxu0 %v34_v23 }
  0x19   :  { %155 = vmatpush3.msra.mxu0 %v18_v24 }
  0x1a   :  { %156 = vmatprep.subr.mxu0 %v33_v25 }
  0x1b   :  { %157 = vmatpush3.msra.mxu0 %v17_v26 }
  0x1c   :  { %158 = vmatprep.subr.mxu0 %v32_v27 }
  0x1d   :  { %159 = vmatpush3.msra.mxu0 %v16_v28 }
  0x1e   :  { %160 = vmatprep.subr.mxu0 %v31_v29 }
  0x1f   :  { %161 = vmatpush3.msra.mxu0 %v15_v30 }
  0x20   :  { %162 = vmatprep.subr.mxu0 %v30_v31 }
  0x21   :  { %163 = vmatpush3.msra.mxu0 %v14_v32 }
  0x22   :  { %111 = vmatmul.mubr.f32.vlgmr.msra.gmra.mxu0 %v12_v33 }
  0xe2   :  { %v164_v34 = vpop.f32.mrf.mxu0 }
  0xe4   :  { %v165_v35 = vpop.f32.mrf.mxu0 }
  0xe5   :  { %v166_v36 = vadd.f32 %v165_v35, %v164_v34 }
  0xe7   :  { %117 = vst.msk [vmem:[#allocation2] sm:$0xff] %vm116_vm0, %v166_v36 }
  0xe8   :  { %179 = shalt.err (!%p176_p4)
}
  0xe9   :  { %127 = dma.vmem_to_hbm [thread:$0]  %s125_s22, 128, %s313_s2, [#allocation3]  }
  0xea   :  { %188 = dma.done.wait [#allocation3], 128  }
  0xeb   :  { %189 = vsyncadd [#allocation3], 4294967168 }
  0xec   :  { %131 = vsyncpa [#allocation3], 1 }

</bundles_post_ra>
